<compile_context>
chip_gen: v6e
topology: v6e:2x2x1
jax: 0.10.0
libtpu: 0.0.40
codegen_flags: <defaults>
</compile_context>

<pallas_src>
import functools

import jax
import jax.numpy as jnp
from jax.experimental import pallas as pl
from jax.experimental.pallas import tpu as pltpu

EPS = 1e-5


def _round_up(x, m):
    return ((x + m - 1) // m) * m


def _vmem_limit_and_budget():
    """Generation-aware scoped-VMEM limit and per-kernel tile budget (bytes)."""
    cap = 64 * 1024 * 1024  # safe fallback (v7x physical VMEM per TensorCore)
    try:
        info = pltpu.get_tpu_info()
        cap = int(getattr(info, "vmem_capacity_bytes", cap) or cap)
    except Exception:
        pass
    limit = min((cap * 3) // 4, 100 * 1024 * 1024)  # ~96 MiB on v5e/v6e, ~48 MiB on v7x
    budget = (limit * 2) // 3
    return int(limit), int(budget)


def _pick_th(N, H, W, Cin_p, Cp, budget, th_req=None):
    """Output-row tile height, sized against the larger of the two phases."""
    K3 = 3 * Cin_p
    # resident weight block (double-buffered) + halo rows + slack
    fixed = 2 * (3 * K3 * Cp * 2) + 2 * (2 * W * K3 * 2) + (2 << 20)
    # phase 1 / row: x slab (2 bufs + transient) bf16, y bf16 (2 bufs), f32 acc
    per_row_p1 = 3 * (W * K3 * 2) + 2 * (W * Cp * 2) + W * Cp * 4
    # phase 2 / row: y bf16 (2 bufs) + f32 out (2 bufs)
    per_row_p2 = 2 * (W * Cp * 2) + 2 * (W * Cp * 4)
    per_row = max(per_row_p1, per_row_p2)
    th_fit = max(1, (budget - fixed) // per_row)
    th = H if th_req is None else int(th_req)
    th = max(1, min(th, int(th_fit), H))
    # keep >= 4 grid tiles so v7x's two TensorCores both get work
    tiles_per_image = -(-4 // max(1, N))            # ceil(4 / N)
    if tiles_per_image > 1:
        th = min(th, -(-H // tiles_per_image))      # ceil(H / tiles_per_image)
    return max(1, th)


# ----------------------------- kernels ------------------------------------ #
def _conv_stats_kernel(x_ref, w_ref, y_ref, stats_ref, *, h_total):
    """3x3 conv (3 ky-tap MXU matmuls) + per-tile BN partial stats.

    x_ref:     (th+2, W, 3*Cin_p) bf16  kx-folded row tile with 2-row halo
    w_ref:     (3, 3*Cin_p, Cp)   bf16  per-ky-tap weights (reused block)
    y_ref:     (th, W, Cp)        bf16  conv output tile
    stats_ref: (2, Cp)            f32   row0 = sum(y), row1 = sum((y - tile_mean)^2)
    """
    th, W, Cp = y_ref.shape
    K3 = x_ref.shape[-1]
    tm = th * W

    acc = jnp.zeros((tm, Cp), jnp.float32)
    for ky in range(3):  # unrolled: 3 accumulating MXU matmuls
        a = x_ref[ky:ky + th, :, :].reshape(tm, K3)
        acc = acc + jnp.dot(a, w_ref[ky, :, :], preferred_element_type=jnp.float32)

    # bf16 intermediate; BN statistics are taken from the f32 accumulator below.
    y_ref[...] = acc.reshape(th, W, Cp).astype(y_ref.dtype)

    # Per-tile partials over the *real* output rows only (rows past H see the
    # bottom halo, so they must be masked out of both sum and M2).
    n_real = jnp.minimum(th, h_total - pl.program_id(1) * th) * W    # int32 scalar
    mask = jax.lax.broadcasted_iota(jnp.int32, (tm, 1), 0) < n_real
    am = jnp.where(mask, acc, 0.0)
    s = jnp.sum(am, axis=0, keepdims=True)                           # (1, Cp)
    mu = s / n_real.astype(jnp.float32)
    d = jnp.where(mask, acc - mu, 0.0)
    m2 = jnp.sum(d * d, axis=0, keepdims=True)                       # (1, Cp)
    stats_ref[...] = jnp.concatenate([s, m2], axis=0)                # (2, Cp)


def _bn_relu_kernel(y_ref, scale_ref, shift_ref, o_ref):
    """Single FMA + ReLU; scale/shift are (1, Cp) f32 blocks reused across the grid."""
    cp = o_ref.shape[-1]
    s = scale_ref[...].reshape(1, 1, cp)
    b = shift_ref[...].reshape(1, 1, cp)
    o_ref[...] = jnp.maximum(y_ref[...].astype(jnp.float32) * s + b, 0.0)


# ----------------------------- wrapper ------------------------------------ #
def conv_batch_norm(x_nchw, weight, bias, gamma, beta, *, th=None):
    """Conv2d(3x3, pad=1) -> BatchNorm2d (training batch stats) -> ReLU.

    x_nchw: (N, Cin, H, W) f32; weight: (Cout, Cin, 3, 3); bias/gamma/beta: (Cout,).
    Returns (N, Cout, H, W) f32.

    NOTE: the conv bias is folded away -- exact only for training-mode BN
    (batch statistics are shift invariant). Re-apply it for eval/running stats.
    """
    N, Cin, H, W = map(int, x_nchw.shape)
    Cout = int(weight.shape[0])
    Cin_p = _round_up(Cin, 8)           # sublane-friendly contraction sub-dim
    K3 = 3 * Cin_p
    Cp = _round_up(Cout, 128)           # lane-dense output channels
    M = N * H * W

    vmem_limit, budget = _vmem_limit_and_budget()
    th_ = _pick_th(N, H, W, Cin_p, Cp, budget, th)
    n_h = -(-H // th_)
    Hp = n_h * th_

    # --- input staging (pure data movement, ~3.2x input bytes in bf16) ---
    x = jnp.transpose(x_nchw, (0, 2, 3, 1)).astype(jnp.bfloat16)              # NHWC
    xp = jnp.pad(x, ((0, 0), (1, 1 + Hp - H), (1, 1), (0, Cin_p - Cin)))      # (N, Hp+2, W+2, Cin_p)
    # fold the kx (horizontal) taps into channels: (N, Hp+2, W, 3*Cin_p)
    xkx = jnp.concatenate([xp[:, :, kx:kx + W, :] for kx in range(3)], axis=-1)
    # per-row-tile slabs with a 2-row halo: (N, n_h, th+2, W, 3*Cin_p)
    xt = jnp.stack([xkx[:, i * th_: i * th_ + th_ + 2] for i in range(n_h)], axis=1)

    # torch weight (Cout, Cin, ky, kx) -> (ky, kx*Cin_p, Cout) -> pad Cout -> Cp
    w4 = jnp.pad(weight.astype(jnp.float32),
                 ((0, 0), (0, Cin_p - Cin), (0, 0), (0, 0)))
    w = jnp.transpose(w4, (2, 3, 1, 0)).reshape(3, K3, Cout)
    w = jnp.pad(w, ((0, 0), (0, 0), (0, Cp - Cout))).astype(jnp.bfloat16)

    # --- phase 1: in-kernel 3x3 conv (3 ky-tap matmuls) + per-tile stats ---
    flops1 = 2 * N * Hp * W * (3 * K3) * Cp + 8 * N * Hp * W * Cp
    bytes1 = xt.size * 2 + w.size * 2 + N * Hp * W * Cp * 2 + N * n_h * 2 * Cp * 4
    y_p, stats = pl.pallas_call(
        functools.partial(_conv_stats_kernel, h_total=H),
        grid=(N, n_h),
        in_specs=[
            pl.BlockSpec((None, None, th_ + 2, W, K3), lambda n, i: (n, i, 0, 0, 0)),
            pl.BlockSpec((3, K3, Cp), lambda n, i: (0, 0, 0)),     # reused weight block
        ],
        out_specs=(
            pl.BlockSpec((None, th_, W, Cp), lambda n, i: (n, i, 0, 0)),
            pl.BlockSpec((None, None, 2, Cp), lambda n, i: (n, i, 0, 0)),
        ),
        out_shape=(
            jax.ShapeDtypeStruct((N, Hp, W, Cp), jnp.bfloat16),    # bf16 intermediate
            jax.ShapeDtypeStruct((N, n_h, 2, Cp), jnp.float32),
        ),
        compiler_params=pltpu.CompilerParams(
            dimension_semantics=("parallel", "parallel"),
            vmem_limit_bytes=vmem_limit,
        ),
        cost_estimate=pl.CostEstimate(
            flops=int(flops1), transcendentals=0, bytes_accessed=int(bytes1)),
    )(xt, w)

    # --- tiny O(n_tiles * Cp) combine: Chan parallel variance -> scale/shift ---
    # Conv bias cancels exactly under training-mode BN (batch stats are shift
    # invariant), so it is folded away instead of a per-element add.
    del bias
    counts = jnp.asarray(
        [min(th_, H - i * th_) * W for i in range(n_h)], jnp.float32)[None, :, None]
    sum_t, m2_t = stats[:, :, 0, :], stats[:, :, 1, :]              # (N, n_h, Cp)
    mean = jnp.sum(sum_t, axis=(0, 1)) / float(M)                   # (Cp,)
    ss = jnp.sum(m2_t + counts * jnp.square(sum_t / counts - mean), axis=(0, 1))
    var = ss / float(M)                                             # biased, as in BN training
    inv_std = jax.lax.rsqrt(var + EPS)
    g_p = jnp.pad(gamma.astype(jnp.float32), (0, Cp - Cout))
    b_p = jnp.pad(beta.astype(jnp.float32), (0, Cp - Cout))
    scale = (g_p * inv_std).reshape(1, Cp)
    shift = (b_p - mean * g_p * inv_std).reshape(1, Cp)

    # --- phase 2: y * scale + shift, ReLU ---
    flops2 = 3 * N * Hp * W * Cp
    bytes2 = N * Hp * W * Cp * (2 + 4) + 2 * Cp * 4
    out_p = pl.pallas_call(
        _bn_relu_kernel,
        grid=(N, n_h),
        in_specs=[
            pl.BlockSpec((None, th_, W, Cp), lambda n, i: (n, i, 0, 0)),
            pl.BlockSpec((1, Cp), lambda n, i: (0, 0)),
            pl.BlockSpec((1, Cp), lambda n, i: (0, 0)),
        ],
        out_specs=pl.BlockSpec((None, th_, W, Cp), lambda n, i: (n, i, 0, 0)),
        out_shape=jax.ShapeDtypeStruct((N, Hp, W, Cp), jnp.float32),
        compiler_params=pltpu.CompilerParams(
            dimension_semantics=("parallel", "parallel"),
            vmem_limit_bytes=vmem_limit,
        ),
        cost_estimate=pl.CostEstimate(
            flops=int(flops2), transcendentals=0, bytes_accessed=int(bytes2)),
    )(y_p, scale, shift)

    # drop row/channel padding, NHWC -> NCHW (consumer expects PyTorch layout)
    out = out_p[:, :H, :, :Cout]
    return jnp.transpose(out, (0, 3, 1, 2))


# ----------------------------- reference ---------------------------------- #
def _reference(x, weight, bias, gamma, beta):
    """Pure-JAX f32 reference matching PyTorch ConvBatchNorm.forward (training)."""
    y = jax.lax.conv_general_dilated(
        x, weight, window_strides=(1, 1), padding=((1, 1), (1, 1)),
        dimension_numbers=("NCHW", "OIHW", "NCHW"))
    y = y + bias[None, :, None, None]
    mean = jnp.mean(y, axis=(0, 2, 3), keepdims=True)
    var = jnp.mean((y - mean) ** 2, axis=(0, 2, 3), keepdims=True)
    y_hat = (y - mean) / jnp.sqrt(var + EPS)
    out = y_hat * gamma[None, :, None, None] + beta[None, :, None, None]
    return jnp.maximum(out, 0.0)


if __name__ == "__main__":
    key = jax.random.PRNGKey(0)
    k_x, k_w, k_b, k_g, k_be = jax.random.split(key, 5)

    N, Cin, H, W = 2, 4, 16, 16
    Cout = 8

    x = jax.random.normal(k_x, (N, Cin, H, W), dtype=jnp.float32)
    weight = jax.random.normal(k_w, (Cout, Cin, 3, 3), dtype=jnp.float32) * 0.1
    bias = jax.random.normal(k_b, (Cout,), dtype=jnp.float32) * 0.1
    gamma = 1.0 + 0.1 * jax.random.normal(k_g, (Cout,), dtype=jnp.float32)
    beta = 0.1 * jax.random.normal(k_be, (Cout,), dtype=jnp.float32)

    fn = jax.jit(conv_batch_norm)
    out = jax.block_until_ready(fn(x, weight, bias, gamma, beta))

    ref = jax.block_until_ready(_reference(x, weight, bias, gamma, beta))
    # Tolerance accounts for the bf16 MXU operands / bf16 y intermediate vs f32 ref.
    if not jnp.allclose(out, ref, atol=2e-2, rtol=2e-2):
        err = float(jnp.max(jnp.abs(out - ref)))
        raise AssertionError(f"Pallas kernel output mismatch vs reference (max |err|={err})")

    print("KERNEL_OK")
</pallas_src>

<mosaic_0001>
module attributes {stable_mosaic.version = 11 : i64} {
  func.func @_conv_stats_kernel(%arg0: i32, %arg1: i32, %arg2: memref<1x1x10x16x24xbf16, #tpu.memory_space<vmem>>, %arg3: memref<3x24x128xbf16, #tpu.memory_space<vmem>>, %arg4: memref<1x8x16x128xbf16, #tpu.memory_space<vmem>>, %arg5: memref<1x1x2x128xf32, #tpu.memory_space<vmem>>) attributes {dimension_semantics = [#tpu.dimension_semantics<parallel>, #tpu.dimension_semantics<parallel>], iteration_bounds = array<i64: 2, 2>, scalar_prefetch = 0 : i64, scratch_operands = 0 : i64, tpu.core_type = #tpu.core_type<tc>, window_params = [{transform_indices = @transform_0, window_bounds = array<i64: 1, 1, 10, 16, 24>}, {pipeline_mode = #tpu.pipeline_mode<synchronous>, transform_indices = @transform_1, window_bounds = array<i64: 3, 24, 128>}, {transform_indices = @transform_2, window_bounds = array<i64: 1, 8, 16, 128>}, {transform_indices = @transform_3, window_bounds = array<i64: 1, 1, 2, 128>}]} {
    %cst = arith.constant 0.000000e+00 : f32
    %0 = vector.broadcast %cst : f32 to vector<128x128xf32>
    %c0 = arith.constant 0 : index
    %c0_0 = arith.constant 0 : index
    %c0_1 = arith.constant 0 : index
    %c0_2 = arith.constant 0 : index
    %c0_3 = arith.constant 0 : index
    %1 = vector.load %arg2[%c0, %c0_0, %c0_1, %c0_2, %c0_3] : memref<1x1x10x16x24xbf16, #tpu.memory_space<vmem>>, vector<1x1x8x16x24xbf16>
    %2 = vector.shape_cast %1 : vector<1x1x8x16x24xbf16> to vector<8x16x24xbf16>
    %3 = vector.shape_cast %2 : vector<8x16x24xbf16> to vector<128x24xbf16>
    %c0_4 = arith.constant 0 : index
    %c0_5 = arith.constant 0 : index
    %c0_6 = arith.constant 0 : index
    %4 = vector.load %arg3[%c0_4, %c0_5, %c0_6] : memref<3x24x128xbf16, #tpu.memory_space<vmem>>, vector<1x24x128xbf16>
    %5 = vector.shape_cast %4 : vector<1x24x128xbf16> to vector<24x128xbf16>
    %cst_7 = arith.constant dense<0.000000e+00> : vector<128x128xf32>
    %6 = tpu.matmul %3, %5, %cst_7 {dimension_numbers = #tpu.dot_dimension_numbers<[1], [0], [0], [1], [0, 0, 1, 1], [], []>} : vector<128x24xbf16>, vector<24x128xbf16>, vector<128x128xf32> -> vector<128x128xf32>
    %7 = arith.addf %0, %6 : vector<128x128xf32>
    %c0_8 = arith.constant 0 : index
    %c0_9 = arith.constant 0 : index
    %c1 = arith.constant 1 : index
    %c0_10 = arith.constant 0 : index
    %c0_11 = arith.constant 0 : index
    %8 = vector.load %arg2[%c0_8, %c0_9, %c1, %c0_10, %c0_11] : memref<1x1x10x16x24xbf16, #tpu.memory_space<vmem>>, vector<1x1x8x16x24xbf16>
    %9 = vector.shape_cast %8 : vector<1x1x8x16x24xbf16> to vector<8x16x24xbf16>
    %10 = vector.shape_cast %9 : vector<8x16x24xbf16> to vector<128x24xbf16>
    %c1_12 = arith.constant 1 : index
    %c0_13 = arith.constant 0 : index
    %c0_14 = arith.constant 0 : index
    %11 = vector.load %arg3[%c1_12, %c0_13, %c0_14] : memref<3x24x128xbf16, #tpu.memory_space<vmem>>, vector<1x24x128xbf16>
    %12 = vector.shape_cast %11 : vector<1x24x128xbf16> to vector<24x128xbf16>
    %cst_15 = arith.constant dense<0.000000e+00> : vector<128x128xf32>
    %13 = tpu.matmul %10, %12, %cst_15 {dimension_numbers = #tpu.dot_dimension_numbers<[1], [0], [0], [1], [0, 0, 1, 1], [], []>} : vector<128x24xbf16>, vector<24x128xbf16>, vector<128x128xf32> -> vector<128x128xf32>
    %14 = arith.addf %7, %13 : vector<128x128xf32>
    %c0_16 = arith.constant 0 : index
    %c0_17 = arith.constant 0 : index
    %c2 = arith.constant 2 : index
    %c0_18 = arith.constant 0 : index
    %c0_19 = arith.constant 0 : index
    %15 = vector.load %arg2[%c0_16, %c0_17, %c2, %c0_18, %c0_19] : memref<1x1x10x16x24xbf16, #tpu.memory_space<vmem>>, vector<1x1x8x16x24xbf16>
    %16 = vector.shape_cast %15 : vector<1x1x8x16x24xbf16> to vector<8x16x24xbf16>
    %17 = vector.shape_cast %16 : vector<8x16x24xbf16> to vector<128x24xbf16>
    %c2_20 = arith.constant 2 : index
    %c0_21 = arith.constant 0 : index
    %c0_22 = arith.constant 0 : index
    %18 = vector.load %arg3[%c2_20, %c0_21, %c0_22] : memref<3x24x128xbf16, #tpu.memory_space<vmem>>, vector<1x24x128xbf16>
    %19 = vector.shape_cast %18 : vector<1x24x128xbf16> to vector<24x128xbf16>
    %cst_23 = arith.constant dense<0.000000e+00> : vector<128x128xf32>
    %20 = tpu.matmul %17, %19, %cst_23 {dimension_numbers = #tpu.dot_dimension_numbers<[1], [0], [0], [1], [0, 0, 1, 1], [], []>} : vector<128x24xbf16>, vector<24x128xbf16>, vector<128x128xf32> -> vector<128x128xf32>
    %21 = arith.addf %14, %20 : vector<128x128xf32>
    %22 = vector.shape_cast %21 : vector<128x128xf32> to vector<8x16x128xf32>
    %23 = arith.truncf %22 : vector<8x16x128xf32> to vector<8x16x128xbf16>
    %c0_24 = arith.constant 0 : index
    %c0_25 = arith.constant 0 : index
    %c0_26 = arith.constant 0 : index
    %c0_27 = arith.constant 0 : index
    %24 = vector.load %arg4[%c0_24, %c0_25, %c0_26, %c0_27] : memref<1x8x16x128xbf16, #tpu.memory_space<vmem>>, vector<1x8x16x128xbf16>
    %25 = vector.shape_cast %24 : vector<1x8x16x128xbf16> to vector<8x16x128xbf16>
    %26 = vector.shape_cast %23 : vector<8x16x128xbf16> to vector<1x8x16x128xbf16>
    tpu.vector_store %arg4[%c0_24, %c0_25, %c0_26, %c0_27], %26 {strides = array<i32>} : memref<1x8x16x128xbf16, #tpu.memory_space<vmem>>, vector<1x8x16x128xbf16>,
    %c8_i32 = arith.constant 8 : i32
    %27 = arith.muli %arg1, %c8_i32 : i32
    %c16_i32 = arith.constant 16 : i32
    %28 = arith.subi %c16_i32, %27 : i32
    %c8_i32_28 = arith.constant 8 : i32
    %29 = arith.minsi %c8_i32_28, %28 : i32
    %c16_i32_29 = arith.constant 16 : i32
    %30 = arith.muli %29, %c16_i32_29 : i32
    %31 = tpu.iota {dimensions = array<i32: 0>} : vector<128x1xi32>
    %32 = vector.broadcast %30 : i32 to vector<128x1xi32>
    %33 = arith.cmpi slt, %31, %32 : vector<128x1xi32>
    %cst_30 = arith.constant 0.000000e+00 : f32
    %34 = vector.shape_cast %33 : vector<128x1xi1> to vector<128x1xi1>
    %35 = vector.broadcast %34 : vector<128x1xi1> to vector<128x128xi1>
    %36 = vector.broadcast %cst_30 : f32 to vector<128x128xf32>
    %37 = arith.select %35, %21, %36 : vector<128x128xi1>, vector<128x128xf32>
    %cst_31 = arith.constant dense<0.000000e+00> : vector<128xf32>
    %38 = vector.multi_reduction <add>, %37, %cst_31 [0] : vector<128x128xf32> to vector<128xf32>
    %39 = vector.shape_cast %38 : vector<128xf32> to vector<1x128xf32>
    %40 = arith.sitofp %30 : i32 to f32
    %41 = vector.broadcast %40 : f32 to vector<1x128xf32>
    %42 = arith.divf %39, %41 : vector<1x128xf32>
    %43 = vector.broadcast %42 : vector<1x128xf32> to vector<128x128xf32>
    %44 = arith.subf %21, %43 : vector<128x128xf32>
    %cst_32 = arith.constant 0.000000e+00 : f32
    %45 = vector.shape_cast %33 : vector<128x1xi1> to vector<128x1xi1>
    %46 = vector.broadcast %45 : vector<128x1xi1> to vector<128x128xi1>
    %47 = vector.broadcast %cst_32 : f32 to vector<128x128xf32>
    %48 = arith.select %46, %44, %47 : vector<128x128xi1>, vector<128x128xf32>
    %49 = arith.mulf %48, %48 : vector<128x128xf32>
    %cst_33 = arith.constant dense<0.000000e+00> : vector<128xf32>
    %50 = vector.multi_reduction <add>, %49, %cst_33 [0] : vector<128x128xf32> to vector<128xf32>
    %51 = vector.shape_cast %50 : vector<128xf32> to vector<1x128xf32>
    %52 = tpu.concatenate %39, %51 in 0 : vector<1x128xf32>, vector<1x128xf32> -> vector<2x128xf32>
    %c0_34 = arith.constant 0 : index
    %c0_35 = arith.constant 0 : index
    %c0_36 = arith.constant 0 : index
    %c0_37 = arith.constant 0 : index
    %53 = vector.load %arg5[%c0_34, %c0_35, %c0_36, %c0_37] : memref<1x1x2x128xf32, #tpu.memory_space<vmem>>, vector<1x1x2x128xf32>
    %54 = vector.shape_cast %53 : vector<1x1x2x128xf32> to vector<2x128xf32>
    %55 = vector.shape_cast %52 : vector<2x128xf32> to vector<1x1x2x128xf32>
    tpu.vector_store %arg5[%c0_34, %c0_35, %c0_36, %c0_37], %55 {strides = array<i32>} : memref<1x1x2x128xf32, #tpu.memory_space<vmem>>, vector<1x1x2x128xf32>,
    return
  }
  func.func @transform_0(%arg0: i32, %arg1: i32) -> (i32, i32, i32, i32, i32) {
    %c0_i32 = arith.constant 0 : i32
    %c0_i32_0 = arith.constant 0 : i32
    %c0_i32_1 = arith.constant 0 : i32
    %c0_i32_2 = arith.constant 0 : i32
    return %arg0, %arg1, %c0_i32, %c0_i32_0, %c0_i32_1 : i32, i32, i32, i32, i32
  }
  func.func @transform_1(%arg0: i32, %arg1: i32) -> (i32, i32, i32) {
    %c0_i32 = arith.constant 0 : i32
    %c0_i32_0 = arith.constant 0 : i32
    %c0_i32_1 = arith.constant 0 : i32
    %c0_i32_2 = arith.constant 0 : i32
    return %c0_i32, %c0_i32_0, %c0_i32_1 : i32, i32, i32
  }
  func.func @transform_2(%arg0: i32, %arg1: i32) -> (i32, i32, i32, i32) {
    %c0_i32 = arith.constant 0 : i32
    %c0_i32_0 = arith.constant 0 : i32
    %c0_i32_1 = arith.constant 0 : i32
    return %arg0, %arg1, %c0_i32, %c0_i32_0 : i32, i32, i32, i32
  }
  func.func @transform_3(%arg0: i32, %arg1: i32) -> (i32, i32, i32, i32) {
    %c0_i32 = arith.constant 0 : i32
    %c0_i32_0 = arith.constant 0 : i32
    %c0_i32_1 = arith.constant 0 : i32
    return %arg0, %arg1, %c0_i32, %c0_i32_0 : i32, i32, i32, i32
  }
}

module attributes {stable_mosaic.version = 11 : i64} {
  func.func @_bn_relu_kernel(%arg0: i32, %arg1: i32, %arg2: memref<1x8x16x128xbf16, #tpu.memory_space<vmem>>, %arg3: memref<1x128xf32, #tpu.memory_space<vmem>>, %arg4: memref<1x128xf32, #tpu.memory_space<vmem>>, %arg5: memref<1x8x16x128xf32, #tpu.memory_space<vmem>>) attributes {dimension_semantics = [#tpu.dimension_semantics<parallel>, #tpu.dimension_semantics<parallel>], iteration_bounds = array<i64: 2, 2>, scalar_prefetch = 0 : i64, scratch_operands = 0 : i64, tpu.core_type = #tpu.core_type<tc>, window_params = [{transform_indices = @transform_0, window_bounds = array<i64: 1, 8, 16, 128>}, {pipeline_mode = #tpu.pipeline_mode<synchronous>, transform_indices = @transform_1, window_bounds = array<i64: 1, 128>}, {pipeline_mode = #tpu.pipeline_mode<synchronous>, transform_indices = @transform_2, window_bounds = array<i64: 1, 128>}, {transform_indices = @transform_3, window_bounds = array<i64: 1, 8, 16, 128>}]} {
    %c0 = arith.constant 0 : index
    %c0_0 = arith.constant 0 : index
    %0 = vector.load %arg3[%c0, %c0_0] : memref<1x128xf32, #tpu.memory_space<vmem>>, vector<1x128xf32>
    %1 = vector.shape_cast %0 : vector<1x128xf32> to vector<1x1x128xf32>
    %c0_1 = arith.constant 0 : index
    %c0_2 = arith.constant 0 : index
    %2 = vector.load %arg4[%c0_1, %c0_2] : memref<1x128xf32, #tpu.memory_space<vmem>>, vector<1x128xf32>
    %3 = vector.shape_cast %2 : vector<1x128xf32> to vector<1x1x128xf32>
    %c0_3 = arith.constant 0 : index
    %c0_4 = arith.constant 0 : index
    %c0_5 = arith.constant 0 : index
    %c0_6 = arith.constant 0 : index
    %4 = vector.load %arg2[%c0_3, %c0_4, %c0_5, %c0_6] : memref<1x8x16x128xbf16, #tpu.memory_space<vmem>>, vector<1x8x16x128xbf16>
    %5 = vector.shape_cast %4 : vector<1x8x16x128xbf16> to vector<8x16x128xbf16>
    %6 = arith.extf %5 : vector<8x16x128xbf16> to vector<8x16x128xf32>
    %7 = vector.broadcast %1 : vector<1x1x128xf32> to vector<8x16x128xf32>
    %8 = arith.mulf %6, %7 : vector<8x16x128xf32>
    %9 = vector.broadcast %3 : vector<1x1x128xf32> to vector<8x16x128xf32>
    %10 = arith.addf %8, %9 : vector<8x16x128xf32>
    %cst = arith.constant 0.000000e+00 : f32
    %11 = vector.broadcast %cst : f32 to vector<8x16x128xf32>
    %12 = arith.maximumf %10, %11 : vector<8x16x128xf32>
    %c0_7 = arith.constant 0 : index
    %c0_8 = arith.constant 0 : index
    %c0_9 = arith.constant 0 : index
    %c0_10 = arith.constant 0 : index
    %13 = vector.load %arg5[%c0_7, %c0_8, %c0_9, %c0_10] : memref<1x8x16x128xf32, #tpu.memory_space<vmem>>, vector<1x8x16x128xf32>
    %14 = vector.shape_cast %13 : vector<1x8x16x128xf32> to vector<8x16x128xf32>
    %15 = vector.shape_cast %12 : vector<8x16x128xf32> to vector<1x8x16x128xf32>
    tpu.vector_store %arg5[%c0_7, %c0_8, %c0_9, %c0_10], %15 {strides = array<i32>} : memref<1x8x16x128xf32, #tpu.memory_space<vmem>>, vector<1x8x16x128xf32>,
    return
  }
  func.func @transform_0(%arg0: i32, %arg1: i32) -> (i32, i32, i32, i32) {
    %c0_i32 = arith.constant 0 : i32
    %c0_i32_0 = arith.constant 0 : i32
    %c0_i32_1 = arith.constant 0 : i32
    return %arg0, %arg1, %c0_i32, %c0_i32_0 : i32, i32, i32, i32
  }
  func.func @transform_1(%arg0: i32, %arg1: i32) -> (i32, i32) {
    %c0_i32 = arith.constant 0 : i32
    %c0_i32_0 = arith.constant 0 : i32
    %c0_i32_1 = arith.constant 0 : i32
    return %c0_i32, %c0_i32_0 : i32, i32
  }
  func.func @transform_2(%arg0: i32, %arg1: i32) -> (i32, i32) {
    %c0_i32 = arith.constant 0 : i32
    %c0_i32_0 = arith.constant 0 : i32
    %c0_i32_1 = arith.constant 0 : i32
    return %c0_i32, %c0_i32_0 : i32, i32
  }
  func.func @transform_3(%arg0: i32, %arg1: i32) -> (i32, i32, i32, i32) {
    %c0_i32 = arith.constant 0 : i32
    %c0_i32_0 = arith.constant 0 : i32
    %c0_i32_1 = arith.constant 0 : i32
    return %arg0, %arg1, %c0_i32, %c0_i32_0 : i32, i32, i32, i32
  }
}

</mosaic_0001>

<bundles_post_ra>
// kernel: conv_batch_norm.3
= control target key start
LH: loop header
LB: loop body
LE: loop exit
PB: predicated region body
PF: predicated region fallthrough
CT: control target
= control target key end

     0   :  { %s580_s12 = smov 0   ;;  %s582_s13 = smov 0   ;;  %s705_s0 = inlined_call_operand.vmem [shape: bf16[2,16,16,128], index: 0, kind: input, shape index: {}]   ;;  %s706_s1 = inlined_call_operand.vmem [shape: f32[1,128], index: 1, kind: input, shape index: {}]   ;;  %s707_s2 = inlined_call_operand.vmem [shape: f32[1,128], index: 2, kind: input, shape index: {}]   ;;  %s708_s3 = inlined_call_operand.vmem [shape: f32[2,16,16,128], index: 3, kind: output, shape index: {}]  }
   0x1   :  { %s584_s14 = smov 0   ;;  %s586_s15 = smov 0  }
   0x2   :  { %s588_s16 = smov 0  }
   0x3 LB: > { %s22_s17 = sadd.s32 1, %s550_s14  ;;  %s25_s18 = sadd.s32 1, %s554_s15  ;;  %s558_s16 = sphi %s588_s16, %s13_s16   ;;  %s554_s15 = sphi %s586_s15, %s712_s15   ;;  %s550_s14 = sphi %s584_s14, %s711_s14   ;;  %s546_s13 = sphi %s582_s13, %s710_s13   ;;  %s542_s12 = sphi %s580_s12, %s709_s12  }
   0x4   : > { %p23_p0 = scmp.ge.s32.totalorder %s22_s17, 2  ;;  %p428_p1 = scmp.ge.s32.totalorder %s558_s16, 1 }
   0x5   : > { %p159_p2 = scmp.lt.s32.totalorder %s558_s16, 5 }
   0x6   : > { %s714_s17 = smov (%p23_p0, %s22_s17), 0  ;;  %s716_s18 = smov (!%p23_p0, %s25_s18), %s554_s15 }
   0x7   : > { %p160_p3 = pnand %p428_p1, %p159_p2  ;;  %p27_p4 = scmp.ge.s32.totalorder %s716_s18, 2 }
   0x8   : > { %s429_s19 = sshll.u32 (!%p160_p3), %s542_s12, 3  ;;  %p194_p5 = scmp.lt.s32.totalorder (!%p160_p3), %s546_s13, 1 }
   0x9   : > { %s718_s18 = smov (%p27_p4, %s716_s18), 0  ;;  %163 = sbr.rel (%p160_p3) target bundleno = 40 (0x28), region = 32 }
   0xa   : > { %p196_p6 = scmp.lt.s32.totalorder (!%p160_p3), %s429_s19, 15 }
   0xe   : > { %s720_s13 = smov (!%p194_p5, %s546_s13), 1  ;;  %s722_s19 = smov (!%p196_p6, %s429_s19), 15  ;;  %v621_v0 = vld [vmem:[%s706_s1] ss:$0 sm:$0xff] }
   0xf   : > { %s431_s20 = sshll.u32 %s720_s13, 5  ;;  %s430_s21 = sshll.u32 %s722_s19, 1  ;;  %v630_v9 = vld [vmem:[%s707_s2] ss:$0 sm:$0xff] }
  0x10   : > { %s610_s22 = sadd.s32 %s431_s20, %s430_s21 }
  0x11   : > { %s432_s23 = sshll.u32 %s610_s22, 2  ;;  %s436_s4 = sshll.u32 %s610_s22, 3 }
  0x12   : > { %s616_s26 = scalar_lea.vmem %s705_s0, %s432_s23  ;;  %s648_s7 = scalar_lea.vmem %s708_s3, %s436_s4 }
  0x13   : > { %v442_v1 = vld [vmem:[%s616_s26] sm:$0xff]   ;;  %v473_v2 = vld [vmem:[%s616_s26 + $0x8] sm:$0xff]   ;;  %v474_v3 = vld [vmem:[%s616_s26 + $0x10] sm:$0xff]  }
  0x14   : > { %v443_v4 = vunpack.c.l.bf16 %v442_v1  ;;  %v444_v5 = vunpack.c.h.bf16 %v442_v1  ;;  %v447_v6 = vunpack.c.l.bf16 %v473_v2  ;;  %v448_v7 = vunpack.c.h.bf16 %v473_v2  ;;  %v475_v8 = vld [vmem:[%s616_s26 + $0x18] sm:$0xff]   ;;  %v476_v30 = vld [vmem:[%s616_s26 + $0x20] sm:$0xff]   ;;  %v477_v31 = vld [vmem:[%s616_s26 + $0x28] sm:$0xff]  }
  0x15   : > { %v451_v10 = vunpack.c.l.bf16 %v474_v3  ;;  %v452_v11 = vunpack.c.h.bf16 %v474_v3  ;;  %v455_v12 = vunpack.c.l.bf16 %v475_v8  ;;  %v456_v13 = vunpack.c.h.bf16 %v475_v8  ;;  %v478_v36 = vld [vmem:[%s616_s26 + $0x30] sm:$0xff]   ;;  %v479_v37 = vld [vmem:[%s616_s26 + $0x38] sm:$0xff]  }
  0x16   : > { %v255_v14 = vmul.f32 %v443_v4, %v621_v0  ;;  %v256_v15 = vmul.f32 %v444_v5, %v621_v0  ;;  %v257_v16 = vmul.f32 %v447_v6, %v621_v0  ;;  %v258_v17 = vmul.f32 %v448_v7, %v621_v0 }
  0x17   : > { %v259_v18 = vmul.f32 %v451_v10, %v621_v0  ;;  %v260_v19 = vmul.f32 %v452_v11, %v621_v0  ;;  %v261_v20 = vmul.f32 %v455_v12, %v621_v0  ;;  %v262_v21 = vmul.f32 %v456_v13, %v621_v0 }
  0x18   : > { %v277_v22 = vadd.f32 %v630_v9, %v255_v14  ;;  %v278_v23 = vadd.f32 %v630_v9, %v256_v15  ;;  %v279_v24 = vadd.f32 %v630_v9, %v257_v16  ;;  %v280_v25 = vadd.f32 %v630_v9, %v258_v17 }
  0x19   : > { %v281_v26 = vadd.f32 %v630_v9, %v259_v18  ;;  %v282_v27 = vadd.f32 %v630_v9, %v260_v19  ;;  %v283_v28 = vadd.f32 %v630_v9, %v261_v20  ;;  %v284_v29 = vadd.f32 %v630_v9, %v262_v21 }
  0x1a   : > { %v293_v32 = vmax.f32 %v277_v22, 0.0  ;;  %v294_v33 = vmax.f32 %v278_v23, 0.0  ;;  %v295_v34 = vmax.f32 %v279_v24, 0.0  ;;  %v296_v35 = vmax.f32 %v280_v25, 0.0 }
  0x1b   : > { %v297_v38 = vmax.f32 %v281_v26, 0.0  ;;  %v298_v39 = vmax.f32 %v282_v27, 0.0  ;;  %v299_v40 = vmax.f32 %v283_v28, 0.0  ;;  %v300_v41 = vmax.f32 %v284_v29, 0.0 }
  0x1c   : > { %309 = vst [vmem:[%s648_s7] sm:$0xff] %v293_v32  ;;  %310 = vst [vmem:[%s648_s7 + $0x8] sm:$0xff] %v294_v33  ;;  %v459_v42 = vunpack.c.l.bf16 %v476_v30  ;;  %v460_v43 = vunpack.c.h.bf16 %v476_v30  ;;  %v463_v44 = vunpack.c.l.bf16 %v477_v31  ;;  %v464_v45 = vunpack.c.h.bf16 %v477_v31 }
  0x1d   : > { %311 = vst [vmem:[%s648_s7 + $0x10] sm:$0xff] %v295_v34  ;;  %312 = vst [vmem:[%s648_s7 + $0x18] sm:$0xff] %v296_v35  ;;  %v467_v46 = vunpack.c.l.bf16 %v478_v36  ;;  %v468_v47 = vunpack.c.h.bf16 %v478_v36  ;;  %v471_v48 = vunpack.c.l.bf16 %v479_v37  ;;  %v472_v49 = vunpack.c.h.bf16 %v479_v37 }
  0x1e   : > { %313 = vst [vmem:[%s648_s7 + $0x20] sm:$0xff] %v297_v38  ;;  %314 = vst [vmem:[%s648_s7 + $0x28] sm:$0xff] %v298_v39  ;;  %v263_v50 = vmul.f32 %v459_v42, %v621_v0  ;;  %v264_v51 = vmul.f32 %v460_v43, %v621_v0  ;;  %v265_v52 = vmul.f32 %v463_v44, %v621_v0 }
  0x1f   : > { %315 = vst [vmem:[%s648_s7 + $0x30] sm:$0xff] %v299_v40  ;;  %316 = vst [vmem:[%s648_s7 + $0x38] sm:$0xff] %v300_v41  ;;  %v266_v53 = vmul.f32 %v464_v45, %v621_v0  ;;  %v267_v54 = vmul.f32 %v467_v46, %v621_v0  ;;  %v268_v55 = vmul.f32 %v468_v47, %v621_v0 }
  0x20   : > { %v269_v56 = vmul.f32 %v471_v48, %v621_v0  ;;  %v270_v57 = vmul.f32 %v472_v49, %v621_v0  ;;  %v285_v58 = vadd.f32 %v630_v9, %v263_v50  ;;  %v286_v59 = vadd.f32 %v630_v9, %v264_v51 }
  0x21   : > { %v287_v60 = vadd.f32 %v630_v9, %v265_v52  ;;  %v288_v61 = vadd.f32 %v630_v9, %v266_v53  ;;  %v289_v62 = vadd.f32 %v630_v9, %v267_v54  ;;  %v290_v63 = vadd.f32 %v630_v9, %v268_v55 }
  0x22   : > { %v291_v0 = vadd.f32 %v630_v9, %v269_v56  ;;  %v292_v1 = vadd.f32 %v630_v9, %v270_v57  ;;  %v301_v2 = vmax.f32 %v285_v58, 0.0  ;;  %v302_v3 = vmax.f32 %v286_v59, 0.0 }
  0x23   : > { %v303_v4 = vmax.f32 %v287_v60, 0.0  ;;  %v304_v5 = vmax.f32 %v288_v61, 0.0  ;;  %v305_v6 = vmax.f32 %v289_v62, 0.0  ;;  %v306_v7 = vmax.f32 %v290_v63, 0.0 }
  0x24   : > { %v307_v8 = vmax.f32 %v291_v0, 0.0  ;;  %v308_v10 = vmax.f32 %v292_v1, 0.0  ;;  %317 = vst [vmem:[%s648_s7 + $0x40] sm:$0xff] %v301_v2  ;;  %318 = vst [vmem:[%s648_s7 + $0x48] sm:$0xff] %v302_v3 }
  0x25   : > { %319 = vst [vmem:[%s648_s7 + $0x50] sm:$0xff] %v303_v4  ;;  %320 = vst [vmem:[%s648_s7 + $0x58] sm:$0xff] %v304_v5 }
  0x26   : > { %321 = vst [vmem:[%s648_s7 + $0x60] sm:$0xff] %v305_v6  ;;  %322 = vst [vmem:[%s648_s7 + $0x68] sm:$0xff] %v306_v7 }
  0x27   : > { %323 = vst [vmem:[%s648_s7 + $0x70] sm:$0xff] %v307_v8  ;;  %324 = vst [vmem:[%s648_s7 + $0x78] sm:$0xff] %v308_v10 }
  0x28 PF: > { %s13_s16 = sadd.s32 1, %s558_s16   ;;  %s709_s12 = smov %s550_s14 }
  0x29   : > { %p10_p7 = scmp.ge.s32.totalorder %s13_s16, 6   ;;  %s710_s13 = smov %s554_s15 }
  0x2a   : > { %s711_s14 = smov %s714_s17  ;;  %s712_s15 = smov %s718_s18 }
  0x2b   :  { %12 = sbr.rel (!%p10_p7) target bundleno = 3 (0x3), region = 62 }

// kernel: conv_batch_norm.2
= control target key start
LH: loop header
LB: loop body
LE: loop exit
PB: predicated region body
PF: predicated region fallthrough
CT: control target
= control target key end

     0   :  { %s1659_s12 = smov 0   ;;  %s1661_s13 = smov 0   ;;  %s2107_s0 = inlined_call_operand.vmem [shape: bf16[2,2,10,16,24], index: 0, kind: input, shape index: {}]   ;;  %s2108_s1 = inlined_call_operand.vmem [shape: bf16[3,24,128], index: 1, kind: input, shape index: {}]   ;;  %s2109_s2 = inlined_call_operand.vmem [shape: bf16[2,16,16,128], index: 2, kind: output, shape index: {0}]   ;;  %s2110_s3 = inlined_call_operand.vmem [shape: f32[2,2,2,128], index: 3, kind: output, shape index: {1}]  }
   0x1   :  { %s1663_s14 = smov 0   ;;  %s1665_s15 = smov 0  }
   0x2   :  { %s1667_s16 = smov 0  }
   0x3 LB: > { %s23_s17 = sadd.s32 1, %s1629_s14  ;;  %s26_s18 = sadd.s32 1, %s1633_s15  ;;  %s1637_s16 = sphi %s1667_s16, %s14_s16   ;;  %s1633_s15 = sphi %s1665_s15, %s2114_s15   ;;  %s1629_s14 = sphi %s1663_s14, %s2113_s14   ;;  %s1625_s13 = sphi %s1661_s13, %s2112_s13   ;;  %s1621_s12 = sphi %s1659_s12, %s2111_s12  }
   0x4   : > { %p24_p0 = scmp.ge.s32.totalorder %s23_s17, 2  ;;  %p1244_p1 = scmp.ge.s32.totalorder %s1637_s16, 1 }
   0x5   : > { %p162_p2 = scmp.lt.s32.totalorder %s1637_s16, 5 }
   0x6   : > { %s2116_s17 = smov (%p24_p0, %s23_s17), 0  ;;  %s2118_s18 = smov (!%p24_p0, %s26_s18), %s1633_s15 }
   0x7   : > { %p163_p3 = pnand %p1244_p1, %p162_p2  ;;  %p28_p4 = scmp.ge.s32.totalorder %s2118_s18, 2 }
   0x8   : > { %p203_p5 = scmp.lt.s32.totalorder (!%p163_p3), %s1625_s13, 1  ;;  %p205_p6 = scmp.lt.s32.totalorder (!%p163_p3), %s1621_s12, 1 }
   0x9   : > { %s2120_s18 = smov (%p28_p4, %s2118_s18), 0  ;;  %166 = sbr.rel (%p163_p3) target bundleno = 339 (0x153), region = 28 }
   0xa   : > { %s1246_s19 = sshll.u32 (!%p163_p3), %s1621_s12, 3 }
   0xb   : > { %s911_s20 = ssub.s32 (!%p163_p3), 16, %s1246_s19  ;;  %p215_p7 = scmp.lt.s32.totalorder (!%p163_p3), %s1246_s19, 15 }
   0xc   : > { %p912_p8 = scmp.lt.s32.totalorder (!%p163_p3), %s911_s20, 8 }
   0xe   : > { %v1567_v0 = vld [vmem:[%s2108_s1 + $0x14] ss:$0 sps:$4 sm:$0xff]   ;;  %vm346_vm0 = vcmask 1043456   ;;  %v1568_v1 = vld [vmem:[%s2108_s1 + $0xc] sm:$0xff]   ;;  %v1571_v3 = vld [vmem:[%s2108_s1 + $0x8] ss:$0 sps:$4 sm:$0xff]   ;;  %v915_v49 = vlaneseq }
   0xf   : > { %1522 = vmatprep.subr.msk.bf16.mxu1 %vm346_vm0, %v1567_v0  ;;  %1521 = vmatprep.subr.msk.bf16.mxu0 %vm346_vm0, %v1567_v0  ;;  %v348_v2 = vsel %vm346_vm0, %v1567_v0, 0  ;;  %s2122_s13 = smov (!%p203_p5, %s1625_s13), 1  ;;  %v1574_v4 = vld [vmem:[%s2108_s1 + $0x20] ss:$0 sps:$4 sm:$0xff]   ;;  %vm321_vm1 = vcmask 195584   ;;  %v1580_v10 = vld [vmem:[%s2108_s1 + $0x18] sm:$0xff]  }
  0x10   : > { %1519 = vmatpush3.bf16.msra.mxu1 %v348_v2  ;;  %1458 = vmatpush3.bf16.msra.mxu0 %v348_v2  ;;  %s1710_s27 = scalar_select %p205_p6, %s1621_s12, 1  ;;  %v1577_v7 = vld [vmem:[%s2108_s1] sm:$0xff]   ;;  %v715_v9 = vsel %vm346_vm0, %v1574_v4, 0  ;;  %v521_v12 = vsel %vm346_vm0, %v1571_v3, 0  ;;  %v1799_v53 = vshrl.u32 %v915_v49, 7 }
  0x11   : > { %1518 = vmatprep.subr.bf16.mxu1 %v1568_v1  ;;  %1459 = vmatprep.subr.bf16.mxu0 %v1568_v1  ;;  %s1526_s28 = smul.u32 40, %s2122_s13  ;;  %s2124_s19 = smov (!%p215_p7, %s1246_s19), 15 }
  0x12   : > { %s1525_s29 = smul.u32 20, %s1710_s27  ;;  %s2126_s20 = smov (!%p912_p8, %s911_s20), 8  ;;  %v1803_v59 = vadd.s32 8, %v1799_v53  ;;  %v1806_v62 = vadd.s32 16, %v1799_v53 }
  0x13   : > { %s1247_s12 = sshll.u32 %s2124_s19, 1  ;;  %s1248_s21 = sshll.u32 %s2122_s13, 5 }
  0x14   : > { %1520 = vmatpush3.bf16.msra.mxu1 %v1568_v1  ;;  %1460 = vmatpush3.bf16.msra.mxu0 %v1568_v1  ;;  %s209_s30 = sadd.s32 %s1526_s28, %s1525_s29  ;;  %s219_s22 = sadd.s32 %s1248_s21, %s1247_s12 }
  0x15   : > { %1523 = vmatprep.subr.msk.bf16.mxu1 %vm346_vm0, %v1571_v3  ;;  %1524 = vmatprep.subr.msk.bf16.mxu0 %vm346_vm0, %v1574_v4  ;;  %s1245_s4 = sshll.u32 %s209_s30, 2  ;;  %s1361_s23 = sshll.u32 %s2126_s20, 4 }
  0x16   : > { %s1719_s7 = scalar_lea.vmem %s2107_s0, %s1245_s4  ;;  %s1249_s24 = sshll.u32 %s219_s22, 2  ;;  %v1810_v63 = vstv %s1361_s23 }
  0x17   : > { %v1569_v5 = vld [vmem:[%s1719_s7 + $0x8] sm:$0xff]   ;;  %v1572_v8 = vld [vmem:[%s1719_s7 + $0x10] sm:$0xff]   ;;  %v1575_v13 = vld [vmem:[%s1719_s7 + $0x18] sm:$0xff]   ;;  %vm933_vm2 = vcmp.lt.s32.totalorder %v1799_v53, %v1810_v63  ;;  %s1823_s28 = scalar_lea.vmem %s2109_s2, %s1249_s24  ;;  %vm934_vm3 = vcmp.lt.s32.totalorder %v1803_v59, %v1810_v63  ;;  %vm935_vm4 = vcmp.lt.s32.totalorder %v1806_v62, %v1810_v63  ;;  %s1018_s29 = scvt.s32.f32 %s1361_s23 }
  0x18   : > { %v1570_v6 = vld [vmem:[%s1719_s7 + $0x28] sm:$0xff]   ;;  %1461 = vmatprep.mubr.msk.bf16.mxu0 %vm321_vm1, %v1569_v5  ;;  %v1573_v11 = vld [vmem:[%s1719_s7 + $0x30] sm:$0xff]   ;;  %v1576_v14 = vld [vmem:[%s1719_s7 + $0x38] sm:$0xff]   ;;  %s1250_s30 = sshll.u32 %s2122_s13, 1 }
  0x19   : > { %1469 = vmatprep.mubr.msk.bf16.mxu1 %vm321_vm1, %v1570_v6  ;;  %1462 = vmatmul.mubr.msk.bf16.vlgmr.msra.gmra.mxu0 %vm321_vm1, %v1572_v8  ;;  %v1578_v15 = vld [vmem:[%s1719_s7 + $0x20] sm:$0xff]   ;;  %v1582_v17 = vld [vmem:[%s1719_s7 + $0x10] sm:$0xff]   ;;  %v1583_v19 = vld [vmem:[%s1719_s7 + $0x8] sm:$0xff]   ;;  %v1826_v6 = vadd.s32 24, %v1799_v53  ;;  %s228_s4 = sadd.s32 %s1250_s30, %s1710_s27 }
  0x1a   : > { %1470 = vmatmul.mubr.msk.bf16.vlgmr.msra.gmra.mxu1 %vm321_vm1, %v1573_v11  ;;  %1498 = vmatpush3.bf16.msra.mxu0 %v715_v9  ;;  %v1579_v16 = vld [vmem:[%s1719_s7 + $0x40] sm:$0xff]   ;;  %v1584_v20 = vld [vmem:[%s1719_s7 + $0x18] sm:$0xff]   ;;  %v1585_v22 = vld [vmem:[%s1719_s7 + $0x10] sm:$0xff]   ;;  %s1251_s5 = sshll.u32 %s228_s4, 1 }
  0x1b   : > { %1478 = vmatpush3.bf16.msra.mxu1 %v521_v12  ;;  %1465 = vmatprep.mubr.msk.bf16.mxu0 %vm321_vm1, %v1575_v13  ;;  %v1581_v18 = vld [vmem:[%s1719_s7] sm:$0xff]   ;;  %v1588_v23 = vld [vmem:[%s1719_s7 + $0x28] sm:$0xff]   ;;  %v1587_v24 = vld [vmem:[%s1719_s7 + $0x18] sm:$0xff]   ;;  %v1841_v13 = vadd.s32 32, %v1799_v53  ;;  %vm936_vm5 = vcmp.lt.s32.totalorder %v1826_v6, %v1810_v63  ;;  %s230_s8 = scalar_lea.vmem %s2110_s3, %s1251_s5 }
  0x1c   : > { %1473 = vmatprep.mubr.msk.bf16.mxu1 %vm321_vm1, %v1576_v14  ;;  %1479 = vmatprep.subr.bf16.mxu1 %v1577_v7  ;;  %v1586_v21 = vld [vmem:[%s1719_s7 + $0x20] sm:$0xff]   ;;  %v1590_v25 = vld [vmem:[%s1719_s7 + $0x30] sm:$0xff]   ;;  %v1592_v27 = vld [vmem:[%s1719_s7 + $0x38] sm:$0xff]  }
  0x1d   : > { %1499 = vmatprep.subr.bf16.mxu0 %v1580_v10  ;;  %v1589_v26 = vld [vmem:[%s1719_s7 + $0x20] sm:$0xff]   ;;  %v1591_v28 = vld [vmem:[%s1719_s7 + $0x28] sm:$0xff]   ;;  %v1593_v30 = vld [vmem:[%s1719_s7 + $0x30] sm:$0xff]   ;;  %vm937_vm6 = vcmp.lt.s32.totalorder %v1841_v13, %v1810_v63 }
  0x1e   : > { %1500 = vmatpush3.bf16.msra.mxu0 %v1580_v10  ;;  %v1594_v29 = vld [vmem:[%s1719_s7 + $0x40] sm:$0xff]   ;;  %v1596_v31 = vld [vmem:[%s1719_s7 + $0x48] sm:$0xff]   ;;  %v1595_v32 = vld [vmem:[%s1719_s7 + $0x38] sm:$0xff]  }
  0x1f   : > { %1480 = vmatpush3.bf16.msra.mxu1 %v1577_v7 }
  0x21   : > { %1466 = vmatmul.mubr.msk.bf16.gmra.mxu0 %vm321_vm1, %v1578_v15 }
  0x22   : > { %1474 = vmatmul.mubr.msk.bf16.gmra.mxu1 %vm321_vm1, %v1579_v16  ;;  %1501 = vmatprep.mubr.msk.bf16.mxu0 %vm321_vm1, %v1582_v17 }
  0x23   : > { %1481 = vmatprep.mubr.msk.bf16.mxu1 %vm321_vm1, %v1581_v18 }
  0x29   : > { %1502 = vmatmul.mubr.msk.bf16.vlgmr.msra.gmra.mxu0 %vm321_vm1, %v1584_v20 }
  0x2a   : > { %1482 = vmatmul.mubr.msk.bf16.vlgmr.msra.gmra.mxu1 %vm321_vm1, %v1583_v19  ;;  %1505 = vmatprep.mubr.msk.bf16.mxu0 %vm321_vm1, %v1586_v21  ;;  %v1853_v21 = vadd.s32 40, %v1799_v53 }
  0x2b   : > { %1485 = vmatprep.mubr.msk.bf16.mxu1 %vm321_vm1, %v1585_v22 }
  0x2c   : > { %vm938_vm7 = vcmp.lt.s32.totalorder %v1853_v21, %v1810_v63 }
  0x31   : > { %1506 = vmatmul.mubr.msk.bf16.gmra.mxu0 %vm321_vm1, %v1588_v23 }
  0x32   : > { %1486 = vmatmul.mubr.msk.bf16.gmra.mxu1 %vm321_vm1, %v1587_v24  ;;  %1509 = vmatprep.mubr.msk.bf16.mxu0 %vm321_vm1, %v1590_v25 }
  0x33   : > { %1489 = vmatprep.mubr.msk.bf16.mxu1 %vm321_vm1, %v1589_v26 }
  0x39   : > { %1510 = vmatmul.mubr.msk.bf16.gmra.mxu0 %vm321_vm1, %v1592_v27  ;;  %v1863_v27 = vadd.s32 48, %v1799_v53 }
  0x3a   : > { %1490 = vmatmul.mubr.msk.bf16.gmra.mxu1 %vm321_vm1, %v1591_v28  ;;  %1513 = vmatprep.mubr.msk.bf16.mxu0 %vm321_vm1, %v1594_v29 }
  0x3b   : > { %1493 = vmatprep.mubr.msk.bf16.mxu1 %vm321_vm1, %v1593_v30  ;;  %vm939_vm8 = vcmp.lt.s32.totalorder %v1863_v27, %v1810_v63 }
  0x41   : > { %1514 = vmatmul.mubr.msk.bf16.gmra.mxu0 %vm321_vm1, %v1596_v31 }
  0x42   : > { %1494 = vmatmul.mubr.msk.bf16.gmra.mxu1 %vm321_vm1, %v1595_v32 }
  0xd9   : > { %v1463_v33 = vpop.f32.mrf.mxu0 }
  0xda   : > { %v1777_v34 = vpop.f32.mrf.mxu1 }
  0xdb   : > { %v384_v35 = vpop.f32.mrf.mxu0 }
  0xdc   : > { %v1779_v36 = vpop.f32.mrf.mxu1 }
  0xdd   : > { %v1464_v37 = vpop.f32.mrf.mxu0 }
  0xde   : > { %v1781_v38 = vpop.f32.mrf.mxu1 }
  0xdf   : > { %v387_v39 = vpop.f32.mrf.mxu0 }
  0xe0   : > { %v1784_v40 = vpop.f32.mrf.mxu1 }
  0xe1   : > { %v1467_v41 = vpop.f32.mrf.mxu0 }
  0xe2   : > { %v1786_v42 = vpop.f32.mrf.mxu1 }
  0xe3   : > { %v400_v43 = vpop.f32.mrf.mxu0 }
  0xe4   : > { %v1788_v44 = vpop.f32.mrf.mxu1 }
  0xe5   : > { %v1468_v45 = vpop.f32.mrf.mxu0 }
  0xe6   : > { %v1790_v46 = vpop.f32.mrf.mxu1 }
  0xe7   : > { %v1792_v47 = vpop.f32.mrf.mxu0 }
  0xe8   : > { %v1794_v48 = vpop.f32.mrf.mxu1 }
  0xe9   : > { %v1503_v50 = vpop.f32.mrf.mxu0 }
  0xea   : > { %v1483_v51 = vpop.f32.mrf.mxu1 }
  0xeb   : > { %v751_v52 = vpop.f32.mrf.mxu0  ;;  %v566_v55 = vadd.f32 %v1483_v51, %v1463_v33  ;;  %v1892_v51 = vadd.s32 64, %v1799_v53 }
  0xec   : > { %v557_v54 = vpop.f32.mrf.mxu1 }
  0xed   : > { %v558_v56 = vadd.f32 %v557_v54, %v384_v35  ;;  %v1504_v57 = vpop.f32.mrf.mxu0  ;;  %v1814_v2 = vadd.f32 %v1503_v50, %v566_v55  ;;  %vm941_vm10 = vcmp.lt.s32.totalorder %v1892_v51, %v1810_v63 }
  0xee   : > { %v1484_v58 = vpop.f32.mrf.mxu1 }
  0xef   : > { %v569_v60 = vadd.f32 %v1484_v58, %v1464_v37  ;;  %v754_v61 = vpop.f32.mrf.mxu0  ;;  %v1812_v0 = vadd.f32 %v751_v52, %v558_v56  ;;  %v983_v22 = vsel %vm935_vm4, %v1814_v2, 0.0  ;;  %v1877_v37 = vadd.s32 56, %v1799_v53 }
  0xf0   : > { %v560_v1 = vpop.f32.mrf.mxu1 }
  0xf1   : > { %v1818_v3 = vadd.f32 %v1504_v57, %v569_v60  ;;  %v561_v4 = vadd.f32 %v560_v1, %v387_v39  ;;  %v1507_v5 = vpop.f32.mrf.mxu0  ;;  %v981_v11 = vsel %vm933_vm2, %v1812_v0, 0.0  ;;  %vm940_vm9 = vcmp.lt.s32.totalorder %v1877_v37, %v1810_v63 }
  0xf2   : > { %v1487_v7 = vpop.f32.mrf.mxu1 }
  0xf3   : > { %v1388_v8 = vpack.c.bf16 %v1818_v3, %v1814_v2  ;;  %v1832_v9 = vadd.f32 %v754_v61, %v561_v4  ;;  %v767_v10 = vpop.f32.mrf.mxu0  ;;  %v582_v16 = vadd.f32 %v1487_v7, %v1467_v41  ;;  %v984_v29 = vsel %vm936_vm5, %v1818_v3, 0.0 }
  0xf4   : > { %v573_v12 = vpop.f32.mrf.mxu1  ;;  %v1906_v61 = vadd.s32 72, %v1799_v53  ;;  %v1917_v7 = vadd.s32 80, %v1799_v53 }
  0xf5   : > { %1420 = vst [vmem:[%s1823_s28 + $0x8] sm:$0xff] %v1388_v8   ;;  %v1383_v14 = vpack.c.bf16 %v1832_v9, %v1812_v0  ;;  %v982_v15 = vsel %vm934_vm3, %v1832_v9, 0.0  ;;  %v574_v17 = vadd.f32 %v573_v12, %v400_v43  ;;  %v1508_v18 = vpop.f32.mrf.mxu0  ;;  %v1871_v30 = vadd.f32 %v1507_v5, %v582_v16 }
  0xf6   : > { %v997_v19 = vadd.f32 %v982_v15, %v981_v11  ;;  %v1488_v20 = vpop.f32.mrf.mxu1  ;;  %v1931_v16 = vadd.s32 88, %v1799_v53  ;;  %vm942_vm11 = vcmp.lt.s32.totalorder %v1906_v61, %v1810_v63  ;;  %vm943_vm12 = vcmp.lt.s32.totalorder %v1917_v7, %v1810_v63 }
  0xf7   : > { %1384 = vst [vmem:[%s1823_s28] sm:$0xff] %v1383_v14   ;;  %v1860_v23 = vadd.f32 %v767_v10, %v574_v17  ;;  %v585_v24 = vadd.f32 %v1488_v20, %v1468_v45  ;;  %v770_v25 = vpop.f32.mrf.mxu0  ;;  %v987_v1 = vsel %vm939_vm8, %v1871_v30, 0.0 }
  0xf8   : > { %v998_v26 = vadd.f32 %v997_v19, %v983_v22  ;;  %v576_v28 = vpop.f32.mrf.mxu1  ;;  %vm944_vm13 = vcmp.lt.s32.totalorder %v1931_v16, %v1810_v63 }
  0xf9   : > { %v1873_v31 = vadd.f32 %v1508_v18, %v585_v24  ;;  %v577_v32 = vadd.f32 %v576_v28, %v1792_v47  ;;  %v1511_v33 = vpop.f32.mrf.mxu0  ;;  %v985_v41 = vsel %vm937_vm6, %v1860_v23, 0.0 }
  0xfa   : > { %v999_v35 = vadd.f32 %v998_v26, %v984_v29  ;;  %v1491_v39 = vpop.f32.mrf.mxu1 }
  0xfb   : > { %v1398_v43 = vpack.c.bf16 %v1873_v31, %v1871_v30  ;;  %v1887_v45 = vadd.f32 %v770_v25, %v577_v32  ;;  %v783_v47 = vpop.f32.mrf.mxu0  ;;  %v598_v55 = vadd.f32 %v1491_v39, %v1777_v34  ;;  %v988_v10 = vsel %vm940_vm9, %v1873_v31, 0.0 }
  0xfc   : > { %v1000_v49 = vadd.f32 %v999_v35, %v985_v41  ;;  %v589_v50 = vpop.f32.mrf.mxu1  ;;  %v1946_v25 = vadd.s32 96, %v1799_v53  ;;  %v1960_v41 = vadd.s32 104, %v1799_v53 }
  0xfd   : > { %1422 = vst [vmem:[%s1823_s28 + $0x18] sm:$0xff] %v1398_v43   ;;  %v1393_v52 = vpack.c.bf16 %v1887_v45, %v1860_v23  ;;  %v986_v54 = vsel %vm938_vm7, %v1887_v45, 0.0  ;;  %v590_v56 = vadd.f32 %v589_v50, %v1779_v36  ;;  %v1512_v57 = vpop.f32.mrf.mxu0  ;;  %v1925_v11 = vadd.f32 %v1511_v33, %v598_v55 }
  0xfe   : > { %v1001_v58 = vadd.f32 %v1000_v49, %v986_v54  ;;  %v1492_v60 = vpop.f32.mrf.mxu1  ;;  %v1971_v49 = vadd.s32 112, %v1799_v53  ;;  %vm945_vm14 = vcmp.lt.s32.totalorder %v1946_v25, %v1810_v63  ;;  %vm946_vm15 = vcmp.lt.s32.totalorder %v1960_v41, %v1810_v63 }
  0xff   : > { %1421 = vst [vmem:[%s1823_s28 + $0x10] sm:$0xff] %v1393_v52   ;;  %v1913_v4 = vadd.f32 %v783_v47, %v590_v56  ;;  %v601_v34 = vadd.f32 %v1492_v60, %v1781_v38  ;;  %v786_v36 = vpop.f32.mrf.mxu0  ;;  %v991_v43 = vsel %vm943_vm12, %v1925_v11, 0.0 }
 0x100   : > { %v1002_v5 = vadd.f32 %v1001_v58, %v987_v1  ;;  %v592_v8 = vpop.f32.mrf.mxu1  ;;  %vm947_vm0 = vcmp.lt.s32.totalorder %v1971_v49, %v1810_v63 }
 0x101   : > { %v1927_v12 = vadd.f32 %v1512_v57, %v601_v34  ;;  %v593_v38 = vadd.f32 %v592_v8, %v1784_v40  ;;  %v1515_v14 = vpop.f32.mrf.mxu0  ;;  %v989_v18 = vsel %vm941_vm10, %v1913_v4, 0.0  ;;  %v1987_v57 = vadd.s32 120, %v1799_v53 }
 0x102   : > { %v1003_v15 = vadd.f32 %v1002_v5, %v988_v10  ;;  %v1495_v17 = vpop.f32.mrf.mxu1  ;;  %v1019_v8 = vstv %s1018_s29 }
 0x103   : > { %v1408_v19 = vpack.c.bf16 %v1927_v12, %v1925_v11  ;;  %v1941_v20 = vadd.f32 %v786_v36, %v593_v38  ;;  %v799_v40 = vpop.f32.mrf.mxu0  ;;  %v614_v29 = vadd.f32 %v1495_v17, %v1786_v42  ;;  %v992_v52 = vsel %vm944_vm13, %v1927_v12, 0.0 }
 0x104   : > { %v1004_v22 = vadd.f32 %v1003_v15, %v989_v18  ;;  %v605_v24 = vpop.f32.mrf.mxu1  ;;  %vm948_vm1 = vcmp.lt.s32.totalorder %v1987_v57, %v1810_v63  ;;  %1597 = vrcp.f32 %v1019_v8 }
 0x105   : > { %1424 = vst [vmem:[%s1823_s28 + $0x28] sm:$0xff] %v1408_v19   ;;  %v1403_v26 = vpack.c.bf16 %v1941_v20, %v1913_v4  ;;  %v990_v28 = vsel %vm942_vm11, %v1941_v20, 0.0  ;;  %v606_v32 = vadd.f32 %v605_v24, %v1788_v44  ;;  %v1516_v39 = vpop.f32.mrf.mxu0  ;;  %v1979_v54 = vadd.f32 %v1515_v14, %v614_v29 }
 0x106   : > { %v1005_v33 = vadd.f32 %v1004_v22, %v990_v28  ;;  %v1496_v35 = vpop.f32.mrf.mxu1 }
 0x107   : > { %1423 = vst [vmem:[%s1823_s28 + $0x20] sm:$0xff] %v1403_v26   ;;  %v1967_v47 = vadd.f32 %v799_v40, %v606_v32  ;;  %v617_v42 = vadd.f32 %v1496_v35, %v1790_v46  ;;  %v802_v58 = vpop.f32.mrf.mxu0  ;;  %v995_v38 = vsel %vm947_vm0, %v1979_v54, 0.0 }
 0x108   : > { %v1006_v44 = vadd.f32 %v1005_v33, %v991_v43  ;;  %v608_v50 = vpop.f32.mrf.mxu1 }
 0x109   : > { %v1981_v55 = vadd.f32 %v1516_v39, %v617_v42  ;;  %v609_v46 = vadd.f32 %v608_v50, %v1794_v48  ;;  %v993_v60 = vsel %vm945_vm14, %v1967_v47, 0.0 }
 0x10a   : > { %v1007_v56 = vadd.f32 %v1006_v44, %v992_v52 }
 0x10b   : > { %v1418_v1 = vpack.c.bf16 %v1981_v55, %v1979_v54  ;;  %v1997_v48 = vadd.f32 %v802_v58, %v609_v46  ;;  %v996_v15 = vsel %vm948_vm1, %v1981_v55, 0.0 }
 0x10c   : > { %v1008_v34 = vadd.f32 %v1007_v56, %v993_v60 }
 0x10d   : > { %1426 = vst [vmem:[%s1823_s28 + $0x38] sm:$0xff] %v1418_v1   ;;  %v1413_v36 = vpack.c.bf16 %v1997_v48, %v1967_v47  ;;  %v994_v5 = vsel %vm946_vm15, %v1997_v48, 0.0 }
 0x10e   : > { %v1009_v10 = vadd.f32 %v1008_v34, %v994_v5 }
 0x10f   : > { %1425 = vst [vmem:[%s1823_s28 + $0x30] sm:$0xff] %v1413_v36  }
 0x110   : > { %v1010_v14 = vadd.f32 %v1009_v10, %v995_v38 }
 0x111   : > { %v1598_v26 = vpop.eup %1597 }
 0x112   : > { %v1011_v17 = vadd.f32 %v1010_v14, %v996_v15 }
 0x114   : > { %v1012_v18 = vrot.slane %v1011_v17, 4 }
 0x116   : > { %v1013_v19 = vadd.f32 %v1012_v18, %v1011_v17 }
 0x118   : > { %v1014_v40 = vrot.slane %v1013_v19, 2 }
 0x11a   : > { %v1015_v22 = vadd.f32 %v1014_v40, %v1013_v19 }
 0x11c   : > { %v1016_v24 = vrot.slane %v1015_v22, 1 }
 0x11e   : > { %v2019_v28 = vadd.f32 %v1016_v24, %v1015_v22 }
 0x120   : > { %v1021_v29 = vmul.f32 %v1598_v26, %v2019_v28 }
 0x122   : > { %v1022_v32 = vsub.f32 %v1812_v0, %v1021_v29  ;;  %v1023_v33 = vsub.f32 %v1832_v9, %v1021_v29  ;;  %v1024_v35 = vsub.f32 %v1814_v2, %v1021_v29  ;;  %v1025_v42 = vsub.f32 %v1818_v3, %v1021_v29 }
 0x123   : > { %v1026_v52 = vsub.f32 %v1860_v23, %v1021_v29  ;;  %v1027_v2 = vsub.f32 %v1887_v45, %v1021_v29  ;;  %v1028_v59 = vsub.f32 %v1871_v30, %v1021_v29  ;;  %v1029_v58 = vsub.f32 %v1873_v31, %v1021_v29 }
 0x124   : > { %v1038_v39 = vsel %vm933_vm2, %v1022_v32, 0.0  ;;  %v1039_v43 = vsel %vm934_vm3, %v1023_v33, 0.0  ;;  %v1040_v0 = vsel %vm935_vm4, %v1024_v35, 0.0  ;;  %v1041_v53 = vsel %vm936_vm5, %v1025_v42, 0.0 }
 0x125   : > { %v1054_v44 = vmul.f32 %v1038_v39, %v1038_v39  ;;  %v1055_v50 = vmul.f32 %v1039_v43, %v1039_v43  ;;  %v1056_v9 = vmul.f32 %v1040_v0, %v1040_v0  ;;  %v1042_v3 = vsel %vm937_vm6, %v1026_v52, 0.0 }
 0x126   : > { %v1057_v56 = vmul.f32 %v1041_v53, %v1041_v53  ;;  %v1043_v62 = vsel %vm938_vm7, %v1027_v2, 0.0  ;;  %v1058_v45 = vmul.f32 %v1042_v3, %v1042_v3  ;;  %v1030_v6 = vsub.f32 %v1913_v4, %v1021_v29 }
 0x127   : > { %v1070_v46 = vadd.f32 %v1055_v50, %v1054_v44  ;;  %v1044_v30 = vsel %vm939_vm8, %v1028_v59, 0.0  ;;  %v1059_v1 = vmul.f32 %v1043_v62, %v1043_v62  ;;  %v1031_v13 = vsub.f32 %v1941_v20, %v1021_v29 }
 0x128   : > { %v1045_v31 = vsel %vm940_vm9, %v1029_v58, 0.0  ;;  %v1060_v36 = vmul.f32 %v1044_v30, %v1044_v30  ;;  %v1032_v21 = vsub.f32 %v1925_v11, %v1021_v29  ;;  %v1046_v4 = vsel %vm941_vm10, %v1030_v6, 0.0 }
 0x129   : > { %v1071_v23 = vadd.f32 %v1070_v46, %v1056_v9  ;;  %v1061_v8 = vmul.f32 %v1045_v31, %v1045_v31  ;;  %v1033_v27 = vsub.f32 %v1927_v12, %v1021_v29  ;;  %v1047_v20 = vsel %vm942_vm11, %v1031_v13, 0.0 }
 0x12a   : > { %v1062_v38 = vmul.f32 %v1046_v4, %v1046_v4  ;;  %v1034_v37 = vsub.f32 %v1967_v47, %v1021_v29  ;;  %v1048_v11 = vsel %vm943_vm12, %v1032_v21, 0.0  ;;  %v1063_v15 = vmul.f32 %v1047_v20, %v1047_v20 }
 0x12b   : > { %v1072_v60 = vadd.f32 %v1071_v23, %v1057_v56  ;;  %v1035_v51 = vsub.f32 %v1997_v48, %v1021_v29  ;;  %v1049_v12 = vsel %vm944_vm13, %v1033_v27, 0.0  ;;  %v1064_v18 = vmul.f32 %v1048_v11, %v1048_v11 }
 0x12c   : > { %v1036_v61 = vsub.f32 %v1979_v54, %v1021_v29  ;;  %v1050_v47 = vsel %vm945_vm14, %v1034_v37, 0.0  ;;  %v1065_v40 = vmul.f32 %v1049_v12, %v1049_v12  ;;  %v1037_v22 = vsub.f32 %v1981_v55, %v1021_v29 }
 0x12d   : > { %v1073_v34 = vadd.f32 %v1072_v60, %v1058_v45  ;;  %v1051_v48 = vsel %vm946_vm15, %v1035_v51, 0.0  ;;  %v1066_v16 = vmul.f32 %v1050_v47, %v1050_v47  ;;  %vm1091_vm2 = vcmask 1040384  }
 0x12e   : > { %v1052_v54 = vsel %vm947_vm0, %v1036_v61, 0.0  ;;  %v1067_v26 = vmul.f32 %v1051_v48, %v1051_v48  ;;  %v1053_v25 = vsel %vm948_vm1, %v1037_v22, 0.0 }
 0x12f   : > { %v1074_v5 = vadd.f32 %v1073_v34, %v1059_v1  ;;  %v1068_v33 = vmul.f32 %v1052_v54, %v1052_v54  ;;  %v1069_v55 = vmul.f32 %v1053_v25, %v1053_v25 }
 0x131   : > { %v1075_v10 = vadd.f32 %v1074_v5, %v1060_v36 }
 0x133   : > { %v1076_v14 = vadd.f32 %v1075_v10, %v1061_v8 }
 0x135   : > { %v1077_v17 = vadd.f32 %v1076_v14, %v1062_v38 }
 0x137   : > { %v1078_v19 = vadd.f32 %v1077_v17, %v1063_v15 }
 0x139   : > { %v1079_v7 = vadd.f32 %v1078_v19, %v1064_v18 }
 0x13b   : > { %v1080_v24 = vadd.f32 %v1079_v7, %v1065_v40 }
 0x13d   : > { %v1081_v32 = vadd.f32 %v1080_v24, %v1066_v16 }
 0x13f   : > { %v1082_v35 = vadd.f32 %v1081_v32, %v1067_v26 }
 0x141   : > { %v1083_v29 = vadd.f32 %v1082_v35, %v1068_v33 }
 0x143   : > { %v1084_v39 = vadd.f32 %v1083_v29, %v1069_v55 }
 0x145   : > { %v1085_v41 = vrot.slane %v1084_v39, 4 }
 0x147   : > { %v1086_v43 = vadd.f32 %v1085_v41, %v1084_v39 }
 0x149   : > { %v1087_v42 = vrot.slane %v1086_v43, 2 }
 0x14b   : > { %v1088_v44 = vadd.f32 %v1087_v42, %v1086_v43 }
 0x14d   : > { %v1089_v49 = vrot.slane %v1088_v44, 1 }
 0x14f   : > { %v1090_v63 = vadd.f32 %v1089_v49, %v1088_v44 }
 0x151   : > { %v1092_v57 = vsel %vm1091_vm2, %v2019_v28, %v1090_v63 }
 0x152   : > { %1093 = vst [vmem:[%s230_s8] sm:$0x3] %v1092_v57 }
 0x153 PF: > { %s14_s16 = sadd.s32 1, %s1637_s16   ;;  %s2111_s12 = smov %s1629_s14 }
 0x154   : > { %p11_p9 = scmp.ge.s32.totalorder %s14_s16, 6   ;;  %s2112_s13 = smov %s1633_s15 }
 0x155   : > { %s2113_s14 = smov %s2116_s17  ;;  %s2114_s15 = smov %s2120_s18 }
 0x156   :  { %13 = sbr.rel (!%p11_p9) target bundleno = 3 (0x3), region = 74 }

</bundles_post_ra>
